<compile_context>
chip_gen: v6e
topology: v6e:2x2x1
jax: 0.10.0
libtpu: 0.0.40
codegen_flags: <defaults>
</compile_context>

<pallas_src>
import jax
import jax.numpy as jnp
from jax.experimental import pallas as pl
from jax.experimental.pallas import tpu as pltpu


_VMEM_WORKING_SET_BUDGET = 40 << 20   # target for the double-buffered working set
_VMEM_LIMIT_CAP = 56 << 20            # stay safely under v7x's 64 MiB physical VMEM


# --------------------------------------------------------------------------
# Kernels
# --------------------------------------------------------------------------
def _add_pe_kernel_2d(x_ref, pe_ref, o_ref):
    # Squeezed layout: all refs are (ts, D); lane/sublane dense, no broadcast.
    o_ref[...] = (x_ref[...] + pe_ref[...]).astype(o_ref.dtype)


def _add_pe_kernel_3d(x_ref, pe_ref, o_ref):
    # Blocked layout: x/o are (ts, tb, D), pe is (ts, 1, D) and broadcasts over
    # the batch sublanes.  The broadcast is free filler in a mem-bound kernel.
    o_ref[...] = (x_ref[...] + pe_ref[...]).astype(o_ref.dtype)


# --------------------------------------------------------------------------
# Tiling helpers
# --------------------------------------------------------------------------
def _round_up(v, m):
    return -(-v // m) * m


def _sublane(itemsize):
    return max(8, 32 // itemsize)  # 8 rows f32, 16 bf16, 32 int8


def _round_rows(rows, sublane, full):
    """Round a row count down to a sublane multiple, clamped to [sublane, full]."""
    if rows >= full:
        return full
    return max(sublane, (rows // sublane) * sublane)


def _tile_target_bytes():
    """Per-grid-step x-tile target by generation (HBM BW vs ~0.35 us/step cost)."""
    devs = jax.devices()
    kind = devs[0].device_kind.lower() if devs else ""
    if "7" in kind:          # v7x: ~3.2 TB/s -> amortize the fixed per-step cost harder
        return 4 << 20
    if "v5" in kind:         # v5e: ~820 GB/s -> 1 MiB already covers the step overhead
        return 1 << 20
    if "v6" in kind:         # v6e: ~1.4 TB/s
        return 2 << 20
    return 2 << 20


def _cost(S, B, D, x_item, pe_item):
    return pl.CostEstimate(
        flops=S * B * D,
        transcendentals=0,
        bytes_accessed=2 * S * B * D * x_item + S * D * pe_item,
    )


# --------------------------------------------------------------------------
# pallas_call wrappers
# --------------------------------------------------------------------------
def _call_squeezed(x, pe, seq_tile, target_bytes, donate_x):
    """Lane-dense d_model path: 2-D (ts, D) tiles, batch handled by the grid."""
    S, B, D = x.shape
    x_item = jnp.dtype(x.dtype).itemsize
    pe_item = jnp.dtype(pe.dtype).itemsize
    sub = _sublane(x_item)

    row_bytes = D * x_item
    if seq_tile is not None:
        ts = _round_rows(int(seq_tile), sub, S)
    else:
        ts = _round_rows(max(sub, target_bytes // row_bytes), sub, S)

    def working(ts_):
        # double-buffered {x_in, out, pe} tiles; pe tile is the SAME size as x's
        return 2 * (2 * ts_ * D * x_item + ts_ * D * pe_item)

    while working(ts) > _VMEM_WORKING_SET_BUDGET and ts > sub:
        ts = _round_rows(max(sub, ts // 2), sub, S)
    vmem_limit = int(min(_VMEM_LIMIT_CAP, max(32 << 20, working(ts) + (8 << 20))))

    grid = (pl.cdiv(S, ts), B)  # batch innermost -> pe tile reused across batch
    return pl.pallas_call(
        _add_pe_kernel_2d,
        out_shape=jax.ShapeDtypeStruct((S, B, D), x.dtype),
        grid_spec=pltpu.PrefetchScalarGridSpec(
            num_scalar_prefetch=0,
            grid=grid,
            in_specs=[
                # x[i*ts:(i+1)*ts, b, :] -> dense (ts, D) VMEM tile
                pl.BlockSpec((ts, None, D), lambda i, b: (i, b, 0)),
                # pe block index independent of b -> not re-DMA'd across batch
                pl.BlockSpec((ts, None, D), lambda i, b: (i, 0, 0)),
            ],
            out_specs=pl.BlockSpec((ts, None, D), lambda i, b: (i, b, 0)),
        ),
        compiler_params=pltpu.CompilerParams(
            # seq blocks sharded across TensorCores (v7x megacore); batch kept
            # sequential/innermost so the pe-residency trick is guaranteed.
            dimension_semantics=("parallel", "arbitrary"),
            vmem_limit_bytes=vmem_limit,
        ),
        cost_estimate=_cost(S, B, D, x_item, pe_item),
        input_output_aliases=({0: 0} if donate_x else {}),
    )(x, pe)


def _call_blocked(x, pe, seq_tile, target_bytes, donate_x):
    """Contiguous 3-D block path for small / non-lane-dense d_model."""
    S, B, D = x.shape
    x_item = jnp.dtype(x.dtype).itemsize
    pe_item = jnp.dtype(pe.dtype).itemsize
    sub_x = _sublane(x_item)
    sub_pe = _sublane(pe_item)
    Dp = _round_up(D, 128)  # lane padding of the minor dim in VMEM

    def x_tile_bytes(ts_, tb_):
        return ts_ * _round_up(tb_, sub_x) * Dp * x_item

    def pe_tile_bytes(ts_):
        # middle dim of 1 pads up to a full sublane tile in VMEM
        return ts_ * sub_pe * Dp * pe_item

    def working(ts_, tb_):
        return 2 * (2 * x_tile_bytes(ts_, tb_) + pe_tile_bytes(ts_))

    # The HBM DMA for an x block is one contiguous slab of ts * B*D*itemsize bytes.
    if seq_tile is not None:
        ts = _round_rows(int(seq_tile), sub_x, S)
    else:
        ts = _round_rows(max(sub_x, target_bytes // max(1, B * D * x_item)), sub_x, S)
    tb = B
    # Shrink ts, then tb, until the (padded) double-buffered working set fits.
    while working(ts, tb) > _VMEM_WORKING_SET_BUDGET and ts > sub_x:
        ts = _round_rows(max(sub_x, ts // 2), sub_x, S)
    while working(ts, tb) > _VMEM_WORKING_SET_BUDGET and tb > sub_x:
        tb = _round_rows(max(sub_x, tb // 2), sub_x, B)
    vmem_limit = int(min(_VMEM_LIMIT_CAP, max(32 << 20, working(ts, tb) + (8 << 20))))

    grid = (pl.cdiv(S, ts), pl.cdiv(B, tb))  # batch blocks innermost -> pe resident
    return pl.pallas_call(
        _add_pe_kernel_3d,
        out_shape=jax.ShapeDtypeStruct((S, B, D), x.dtype),
        grid_spec=pltpu.PrefetchScalarGridSpec(
            num_scalar_prefetch=0,
            grid=grid,
            in_specs=[
                pl.BlockSpec((ts, tb, D), lambda i, j: (i, j, 0)),
                pl.BlockSpec((ts, 1, D), lambda i, j: (i, 0, 0)),
            ],
            out_specs=pl.BlockSpec((ts, tb, D), lambda i, j: (i, j, 0)),
        ),
        compiler_params=pltpu.CompilerParams(
            dimension_semantics=("parallel", "arbitrary"),
            vmem_limit_bytes=vmem_limit,
        ),
        cost_estimate=_cost(S, B, D, x_item, pe_item),
        input_output_aliases=({0: 0} if donate_x else {}),
    )(x, pe)


def position_embedding_learned_1d(x, pe, *, batch_first=False, seq_tile=None,
                                  tile_target_bytes=None, donate_x=False):
    """Forward of PositionEmbeddingLearned1D.

    x  : (S, B, D) when batch_first=False
    pe : (max_len, 1, D) learned parameter
    Returns x + pe[:S] (pe broadcast over batch).

    batch_first=True returns x UNCHANGED: the reference module computes `pos`
    on that branch but never adds it to x, and we preserve that behaviour.
    """
    if batch_first:
        return x

    if x.ndim != 3 or pe.ndim != 3 or pe.shape[1] != 1 or pe.shape[2] != x.shape[2]:
        raise ValueError(f"bad shapes: x={x.shape}, pe={pe.shape}")
    S, B, D = x.shape
    if S > pe.shape[0]:
        raise ValueError(f"sequence length {S} exceeds max_len {pe.shape[0]}")

    target = _tile_target_bytes() if tile_target_bytes is None else int(tile_target_bytes)
    x_item = jnp.dtype(x.dtype).itemsize

    # Static layout gate (see header): the squeezed layout's strided per-row HBM
    # DMAs only beat contiguous 3-D blocks when rows are lane-dense and >= ~2 KiB.
    if D % 128 == 0 and D * x_item >= 2048:
        return _call_squeezed(x, pe, seq_tile, target, donate_x)
    # TODO(synk): D small AND B enormous (>> VMEM budget at ts=sublane) would need
    # an additional (S, B*D)-flattened lane-tiled layout; not needed for this model.
    return _call_blocked(x, pe, seq_tile, target, donate_x)


# --------------------------------------------------------------------------
# Self-test
# --------------------------------------------------------------------------
if __name__ == "__main__":
    key = jax.random.PRNGKey(0)
    kx, kpe, kx2, kpe2, kx3, kpe3 = jax.random.split(key, 6)

    # 1) Small, non-lane-dense d_model (blocked path): seq=8, batch=2, d_model=32.
    seq, batch, d_model, max_len = 8, 2, 32, 64
    x = jax.random.normal(kx, (seq, batch, d_model), dtype=jnp.float32)
    pe = jax.random.uniform(kpe, (max_len, 1, d_model), dtype=jnp.float32)  # nn.init.uniform_
    out = jax.block_until_ready(position_embedding_learned_1d(x, pe))
    ref = x + pe[:seq]
    assert out.shape == x.shape and out.dtype == x.dtype
    assert jnp.allclose(out, ref, atol=1e-6), "blocked f32 path mismatch"

    # 2) batch_first=True returns x unchanged (parity with the reference module).
    xb = x.transpose(1, 0, 2)
    assert jnp.array_equal(position_embedding_learned_1d(xb, pe, batch_first=True), xb)

    # 3) Multi-block grid, partial last seq block, mixed bf16 x / f32 pe.
    seq2, batch2 = 40, 3
    x2 = jax.random.normal(kx2, (seq2, batch2, d_model), dtype=jnp.bfloat16)
    pe2 = jax.random.uniform(kpe2, (max_len, 1, d_model), dtype=jnp.float32)
    out2 = jax.block_until_ready(position_embedding_learned_1d(x2, pe2, seq_tile=16))
    ref2 = (x2.astype(jnp.float32) + pe2[:seq2]).astype(jnp.bfloat16)
    assert out2.shape == x2.shape and out2.dtype == x2.dtype
    assert jnp.allclose(out2.astype(jnp.float32), ref2.astype(jnp.float32),
                        atol=1e-2), "bf16/f32 blocked path mismatch"

    # 4) Lane-dense d_model with >= 2 KiB rows (squeezed path): d_model=512 f32.
    seq3, batch3, d3, max_len3 = 24, 2, 512, 32
    x3 = jax.random.normal(kx3, (seq3, batch3, d3), dtype=jnp.float32)
    pe3 = jax.random.uniform(kpe3, (max_len3, 1, d3), dtype=jnp.float32)
    out3 = jax.block_until_ready(position_embedding_learned_1d(x3, pe3, seq_tile=8))
    ref3 = x3 + pe3[:seq3]
    assert out3.shape == x3.shape and out3.dtype == x3.dtype
    assert jnp.allclose(out3, ref3, atol=1e-6), "squeezed f32 path mismatch"

    print("KERNEL_OK")
</pallas_src>

<mosaic_0001>
module attributes {stable_mosaic.version = 11 : i64} {
  func.func @_add_pe_kernel_3d(%arg0: i32, %arg1: i32, %arg2: memref<8x2x32xf32, #tpu.memory_space<vmem>>, %arg3: memref<8x1x32xf32, #tpu.memory_space<vmem>>, %arg4: memref<8x2x32xf32, #tpu.memory_space<vmem>>) attributes {dimension_semantics = [#tpu.dimension_semantics<parallel>, #tpu.dimension_semantics<arbitrary>], iteration_bounds = array<i64: 1, 1>, scalar_prefetch = 0 : i64, scratch_operands = 0 : i64, tpu.core_type = #tpu.core_type<tc>, window_params = [{transform_indices = @transform_0, window_bounds = array<i64: 8, 2, 32>}, {transform_indices = @transform_1, window_bounds = array<i64: 8, 1, 32>}, {transform_indices = @transform_2, window_bounds = array<i64: 8, 2, 32>}]} {
    %c0 = arith.constant 0 : index
    %c0_0 = arith.constant 0 : index
    %c0_1 = arith.constant 0 : index
    %0 = vector.load %arg2[%c0, %c0_0, %c0_1] : memref<8x2x32xf32, #tpu.memory_space<vmem>>, vector<8x2x32xf32>
    %c0_2 = arith.constant 0 : index
    %c0_3 = arith.constant 0 : index
    %c0_4 = arith.constant 0 : index
    %1 = vector.load %arg3[%c0_2, %c0_3, %c0_4] : memref<8x1x32xf32, #tpu.memory_space<vmem>>, vector<8x1x32xf32>
    %2 = vector.broadcast %1 : vector<8x1x32xf32> to vector<8x2x32xf32>
    %3 = arith.addf %0, %2 : vector<8x2x32xf32>
    %c0_5 = arith.constant 0 : index
    %c0_6 = arith.constant 0 : index
    %c0_7 = arith.constant 0 : index
    %4 = vector.load %arg4[%c0_5, %c0_6, %c0_7] : memref<8x2x32xf32, #tpu.memory_space<vmem>>, vector<8x2x32xf32>
    tpu.vector_store %arg4[%c0_5, %c0_6, %c0_7], %3 {strides = array<i32>} : memref<8x2x32xf32, #tpu.memory_space<vmem>>, vector<8x2x32xf32>,
    return
  }
  func.func @transform_0(%arg0: i32, %arg1: i32) -> (i32, i32, i32) {
    %c0_i32 = arith.constant 0 : i32
    %c0_i32_0 = arith.constant 0 : i32
    return %arg0, %arg1, %c0_i32 : i32, i32, i32
  }
  func.func @transform_1(%arg0: i32, %arg1: i32) -> (i32, i32, i32) {
    %c0_i32 = arith.constant 0 : i32
    %c0_i32_0 = arith.constant 0 : i32
    %c0_i32_1 = arith.constant 0 : i32
    return %arg0, %c0_i32, %c0_i32_0 : i32, i32, i32
  }
  func.func @transform_2(%arg0: i32, %arg1: i32) -> (i32, i32, i32) {
    %c0_i32 = arith.constant 0 : i32
    %c0_i32_0 = arith.constant 0 : i32
    return %arg0, %arg1, %c0_i32 : i32, i32, i32
  }
}

</mosaic_0001>

<bundles_post_ra>
// kernel: tpu_custom_call.1
= control target key start
LH: loop header
LB: loop body
LE: loop exit
PB: predicated region body
PF: predicated region fallthrough
CT: control target
= control target key end

     0   :  { %vm84_vm0 = vcmask 254976   ;;  %s219_s0 = inlined_call_operand.vmem [shape: f32[8,2,32], index: 0, kind: input, shape index: {}]   ;;  %s220_s1 = inlined_call_operand.vmem [shape: f32[64,1,32], index: 1, kind: input, shape index: {}]   ;;  %s221_s2 = inlined_call_operand.hbm [shape: f32[8,2,32], index: 2, kind: output, shape index: {}]  }
   0x1   :  { %v12_v0 = vld [vmem:[%s219_s0] sm:$0x3]  ;;  %v13_v3 = vld [vmem:[%s219_s0 + $0x2] sm:$0x3]  ;;  %v14_v5 = vld [vmem:[%s219_s0 + $0x4] sm:$0x3] }
   0x2   :  { %v109_v1 = vld [vmem:[%s220_s1] ss:$0 sm:$0xff]  ;;  %v110_v4 = vld [vmem:[%s220_s1 + $0x1] ss:$0 sm:$0xff]  ;;  %v111_v7 = vld [vmem:[%s220_s1 + $0x2] ss:$0 sm:$0xff] }
   0x3   :  { %v76_v2 = vadd.f32 %v109_v1, %v12_v0  ;;  %v77_v6 = vadd.f32 %v110_v4, %v13_v3  ;;  %v15_v8 = vld [vmem:[%s219_s0 + $0x6] sm:$0x3]  ;;  %v112_v9 = vld [vmem:[%s220_s1 + $0x3] ss:$0 sm:$0xff]  ;;  %v78_v10 = vadd.f32 %v111_v7, %v14_v5  ;;  %v16_v12 = vld [vmem:[%s219_s0 + $0x8] sm:$0x3] }
   0x4   :  { %v79_v11 = vadd.f32 %v112_v9, %v15_v8  ;;  %v113_v13 = vld [vmem:[%s220_s1 + $0x4] ss:$0 sm:$0xff]  ;;  %v17_v14 = vld [vmem:[%s219_s0 + $0xa] sm:$0x3]  ;;  %v114_v16 = vld [vmem:[%s220_s1 + $0x5] ss:$0 sm:$0xff] }
   0x5   :  { %85 = vst.msk [vmem:[#allocation2] sm:$0x3] %vm84_vm0, %v76_v2  ;;  %86 = vst.msk [vmem:[#allocation2 + $0x2] sm:$0x3] %vm84_vm0, %v77_v6  ;;  %v80_v15 = vadd.f32 %v113_v13, %v16_v12  ;;  %v18_v17 = vld [vmem:[%s219_s0 + $0xc] sm:$0x3]  ;;  %v81_v19 = vadd.f32 %v114_v16, %v17_v14 }
   0x6   :  { %v115_v18 = vld [vmem:[%s220_s1 + $0x6] ss:$0 sm:$0xff]  ;;  %87 = vst.msk [vmem:[#allocation2 + $0x4] sm:$0x3] %vm84_vm0, %v78_v10  ;;  %88 = vst.msk [vmem:[#allocation2 + $0x6] sm:$0x3] %vm84_vm0, %v79_v11 }
   0x7   :  { %v82_v20 = vadd.f32 %v115_v18, %v18_v17  ;;  %v19_v21 = vld [vmem:[%s219_s0 + $0xe] sm:$0x3]  ;;  %v116_v22 = vld [vmem:[%s220_s1 + $0x7] ss:$0 sm:$0xff] }
   0x8   :  { %7 = vsyncpa [#allocation3], 0  ;;  %89 = vst.msk [vmem:[#allocation2 + $0x8] sm:$0x3] %vm84_vm0, %v80_v15  ;;  %v83_v23 = vadd.f32 %v116_v22, %v19_v21  ;;  %s142_s13 = smov [#allocation2]  }
   0x9   :  { %s98_s14 = sshll.u32 %s142_s13, 4  ;;  %90 = vst.msk [vmem:[#allocation2 + $0xa] sm:$0x3] %vm84_vm0, %v81_v19  ;;  %91 = vst.msk [vmem:[#allocation2 + $0xc] sm:$0x3] %vm84_vm0, %v82_v20  ;;  %s99_s14 = int_to_ptr.vmem [resolvable:$true] %s98_s14 }
   0xa   :  { %92 = vst.msk [vmem:[#allocation2 + $0xe] sm:$0x3] %vm84_vm0, %v83_v23  ;;  %s120_s15 = scalar_lea.vmem %s99_s14, 256  ;;  %p125_p1 = scmp.lt.s32.totalorder %s99_s14, %s99_s14 }
   0xb   :  { %p121_p0 = scmp.ne.s32.totalorder %s99_s14, %s120_s15  ;;  %p126_p2 = scmp.lt.s32.totalorder %s120_s15, %s120_s15 }
   0xd   :  { %p127_p3 = por %p126_p2, %p125_p1 }
   0xf   :  { %p128_p4 = pnand %p127_p3, %p121_p0 }
  0x11   :  { %131 = shalt.err (!%p128_p4)
}
  0x12   :  { %s143_s0 = smov 32   ;;  %s144_s1 = smov 2  }
  0x13   :  { %104 = dma.vmem_to_hbm [thread:$0]  %s99_s14, 256, %s221_s2, [#allocation3], %s143_s0, %s143_s0, %s144_s1  }
  0x14   :  { %140 = dma.done.wait [#allocation3], 256  }
  0x15   :  { %141 = vsyncadd [#allocation3], 4294967040 }
  0x16   :  { %108 = vsyncpa [#allocation3], 1 }

</bundles_post_ra>
